<compile_context>
chip_gen: v6e
topology: v6e:2x2x1
jax: 0.10.0
libtpu: 0.0.40
codegen_flags: <defaults>
</compile_context>

<pallas_src>
import functools
import math

import jax
import jax.numpy as jnp
from jax.experimental import pallas as pl
from jax.experimental.pallas import tpu as pltpu

_E = float(math.e)


def _time_lstm_kernel(xu_ref, el_ref, h0_ref, c0_ref,
                      wd_t_ref, bd_ref, w_t_ref,
                      out_ref, h_last_ref, c_last_ref,
                      h_scr, c_scr, *, h_pad):
    t = pl.program_id(1)
    last_t = pl.num_programs(1) - 1

    # New batch tile -> (re)load the carried state.
    @pl.when(t == 0)
    def _():
        h_scr[...] = h0_ref[...]
        c_scr[...] = c0_ref[...]

    h = h_scr[...]                       # (TB, Hp) f32
    c = c_scr[...]                       # (TB, Hp) f32

    # ---- time gate: c_adj = (c - c_s1) + c_s1 * elapse  (elapse precomputed) ----
    c_s1 = jnp.tanh(
        jnp.dot(c.astype(wd_t_ref.dtype), wd_t_ref[...],
                preferred_element_type=jnp.float32)
        + bd_ref[...])
    elapse = el_ref[0]                   # (TB, 1), broadcast over lanes
    c_adj = (c - c_s1) + c_s1 * elapse

    # ---- fused gates: one wide MXU dot + streamed precomputed x-projection ----
    gates = (jnp.dot(h.astype(w_t_ref.dtype), w_t_ref[...],
                     preferred_element_type=jnp.float32)
             + xu_ref[0].astype(jnp.float32))            # (TB, 4*Hp)

    f = jax.nn.sigmoid(gates[:, 0 * h_pad:1 * h_pad])
    i = jax.nn.sigmoid(gates[:, 1 * h_pad:2 * h_pad])
    o = jax.nn.sigmoid(gates[:, 2 * h_pad:3 * h_pad])
    c_tmp = jnp.tanh(gates[:, 3 * h_pad:4 * h_pad])

    c_new = f * c_adj + i * c_tmp
    h_new = o * jnp.tanh(c_new)

    h_scr[...] = h_new
    c_scr[...] = c_new
    out_ref[0] = h_new.astype(out_ref.dtype)

    # Only the final time step's state is the module's (h, c) return value.
    @pl.when(t == last_t)
    def _():
        h_last_ref[...] = h_new.astype(h_last_ref.dtype)
        c_last_ref[...] = c_new.astype(c_last_ref.dtype)


def _pick_batch_tile(b):
    cands = (256, 128, 64, 32, 16, 8)
    # Prefer >= 2 batch tiles so both v7x TensorCores get work.
    for c in cands:
        if b % c == 0 and b // c >= 2:
            return c
    for c in cands:
        if b % c == 0:
            return c
    return b


def _round_up(x, m):
    return ((x + m - 1) // m) * m


def time_lstm_cell_forward(inputs, timestamps, params,
                           init_h=None, init_c=None, reverse=False,
                           block_b=None, matmul_dtype=jnp.bfloat16):
    """Pallas TimeLSTMCell.forward.

    inputs:     (B, S, In) float32
    timestamps: (B, S)     float32
    params: dict with nn.Linear layouts:
        W_all_w (4H, H), W_all_b (4H,), U_all_w (4H, In), U_all_b (4H,),
        W_d_w (H, H), W_d_b (H,)
    Returns (outputs (B, S, H), h_last (B, H), c_last (B, H)).
    """
    inputs = jnp.asarray(inputs, jnp.float32)
    timestamps = jnp.asarray(timestamps, jnp.float32)
    B, S, In = inputs.shape
    H = params['W_d_w'].shape[0]
    Hp = _round_up(H, 128)               # lane-dense hidden width

    if init_h is None:
        init_h = jnp.zeros((B, H), jnp.float32)
    if init_c is None:
        init_c = jnp.zeros((B, H), jnp.float32)

    # ---------------- wrapper-side, one-time weight / activation prep ----------------
    f32 = jnp.float32

    # Fused, gate-blocked, pre-transposed W_all: (Hp, 4*Hp), zero-padded per gate.
    W_g = jnp.transpose(params['W_all_w'].reshape(4, H, H), (0, 2, 1))     # (4, Hin, Hout)
    w_t = jnp.zeros((4, Hp, Hp), f32).at[:, :H, :H].set(W_g)
    w_t = jnp.transpose(w_t, (1, 0, 2)).reshape(Hp, 4 * Hp).astype(matmul_dtype)

    # W_d (time-gate) pre-transposed + padded.
    wd_t = jnp.zeros((Hp, Hp), f32).at[:H, :H].set(params['W_d_w'].T).astype(matmul_dtype)
    bd = jnp.zeros((1, Hp), f32).at[0, :H].set(params['W_d_b'])

    # Hoisted input projection for ALL steps: xU = x @ U^T + (b_U + b_W),
    # time-major, gate-blocked + padded -> (S, B, 4*Hp).
    x_t = jnp.transpose(inputs, (1, 0, 2))                                  # (S, B, In)
    U_g = params['U_all_w'].reshape(4, H, In)
    b_g = (params['U_all_b'] + params['W_all_b']).reshape(4, H)
    xu = jnp.einsum('sbi,ghi->sbgh', x_t, U_g,
                    preferred_element_type=jnp.float32) + b_g[None, None]   # (S, B, 4, H)
    xu = jnp.zeros((S, B, 4, Hp), f32).at[..., :H].set(xu)
    xu = xu.reshape(S, B, 4 * Hp).astype(matmul_dtype)

    # Hoisted elapse = 1/log(e + dt), time-major (S, B, 1).
    elapse_t = (1.0 / jnp.log(_E + timestamps)).T.reshape(S, B, 1).astype(f32)

    # Padded initial state.
    h0 = jnp.zeros((B, Hp), f32).at[:, :H].set(init_h)
    c0 = jnp.zeros((B, Hp), f32).at[:, :H].set(init_c)

    # ---------------- tiling ----------------
    if block_b is None:
        block_b = _pick_batch_tile(B)
    assert B % block_b == 0, (
        f"batch {B} must be divisible by block_b {block_b} "
        "(ragged batch tiles would silently drop rows)")
    nb = B // block_b

    # ---------------- VMEM budget derived from actual buffer sizes ----------------
    wsz = jnp.dtype(matmul_dtype).itemsize
    footprint = (
        2 * block_b * 4 * Hp * wsz        # xu stream (double buffered)
        + 2 * block_b * 1 * 4             # elapse stream
        + 2 * 2 * block_b * Hp * 4        # init h, init c
        + 2 * Hp * Hp * wsz               # W_d^T
        + 2 * 1 * Hp * 4                  # b_d
        + 2 * Hp * 4 * Hp * wsz           # fused W_all^T
        + 2 * block_b * Hp * 4            # per-step output block
        + 2 * 2 * block_b * Hp * 4        # h_last, c_last
        + 2 * block_b * Hp * 4            # h/c scratch
    )
    vmem_limit = int(min(max(int(footprint * 1.5), 16 * 2**20), 48 * 2**20))

    kernel = functools.partial(_time_lstm_kernel, h_pad=Hp)

    out_t, h_last, c_last = pl.pallas_call(
        kernel,
        out_shape=(
            jax.ShapeDtypeStruct((S, B, Hp), jnp.float32),
            jax.ShapeDtypeStruct((B, Hp), jnp.float32),
            jax.ShapeDtypeStruct((B, Hp), jnp.float32),
        ),
        grid=(nb, S),
        in_specs=[
            pl.BlockSpec((1, block_b, 4 * Hp), lambda b, t: (t, b, 0)),  # xU (streamed)
            pl.BlockSpec((1, block_b, 1), lambda b, t: (t, b, 0)),       # elapse (streamed)
            pl.BlockSpec((block_b, Hp), lambda b, t: (b, 0)),            # init_h
            pl.BlockSpec((block_b, Hp), lambda b, t: (b, 0)),            # init_c
            pl.BlockSpec((Hp, Hp), lambda b, t: (0, 0)),                 # W_d^T   (resident)
            pl.BlockSpec((1, Hp), lambda b, t: (0, 0)),                  # b_d     (resident)
            pl.BlockSpec((Hp, 4 * Hp), lambda b, t: (0, 0)),             # W_all^T (resident)
        ],
        out_specs=(
            pl.BlockSpec((1, block_b, Hp), lambda b, t: (t, b, 0)),      # outputs (time-major)
            pl.BlockSpec((block_b, Hp), lambda b, t: (b, 0)),            # final h
            pl.BlockSpec((block_b, Hp), lambda b, t: (b, 0)),            # final c
        ),
        scratch_shapes=[
            pltpu.VMEM((block_b, Hp), jnp.float32),   # carried h
            pltpu.VMEM((block_b, Hp), jnp.float32),   # carried c
        ],
        compiler_params=pltpu.CompilerParams(
            dimension_semantics=("parallel", "arbitrary"),
            vmem_limit_bytes=vmem_limit,
        ),
    )(xu, elapse_t, h0, c0, wd_t, bd, w_t)

    outputs = jnp.transpose(out_t, (1, 0, 2))[..., :H]      # (B, S, H)
    if reverse:
        outputs = jnp.flip(outputs, axis=1)                  # matches `outputs.reverse()`
    return outputs, h_last[:, :H], c_last[:, :H]


if __name__ == "__main__":
    B, S, In, H = 8, 8, 16, 32

    key = jax.random.PRNGKey(0)
    ks = jax.random.split(key, 8)
    scale = 0.1
    params = dict(
        W_all_w=jax.random.normal(ks[0], (4 * H, H), jnp.float32) * scale,
        W_all_b=jax.random.normal(ks[1], (4 * H,), jnp.float32) * scale,
        U_all_w=jax.random.normal(ks[2], (4 * H, In), jnp.float32) * scale,
        U_all_b=jax.random.normal(ks[3], (4 * H,), jnp.float32) * scale,
        W_d_w=jax.random.normal(ks[4], (H, H), jnp.float32) * scale,
        W_d_b=jax.random.normal(ks[5], (H,), jnp.float32) * scale,
    )
    inputs = jax.random.normal(ks[6], (B, S, In), jnp.float32)
    timestamps = jax.random.uniform(ks[7], (B, S), jnp.float32,
                                    minval=0.1, maxval=5.0)

    outputs, h_last, c_last = time_lstm_cell_forward(inputs, timestamps, params)
    jax.block_until_ready((outputs, h_last, c_last))

    # ---- pure-JAX f32 reference mirroring the PyTorch forward ----
    def reference(inputs, timestamps, p):
        h = jnp.zeros((B, H), jnp.float32)
        c = jnp.zeros((B, H), jnp.float32)
        outs = []
        for s in range(S):
            c_s1 = jnp.tanh(c @ p['W_d_w'].T + p['W_d_b'])
            elapse = 1.0 / jnp.log(math.e + timestamps[:, s:s + 1])
            c_adj = (c - c_s1) + c_s1 * elapse
            g = (h @ p['W_all_w'].T + p['W_all_b']
                 + inputs[:, s] @ p['U_all_w'].T + p['U_all_b'])
            f, i, o, c_tmp = jnp.split(g, 4, axis=1)
            f, i, o = jax.nn.sigmoid(f), jax.nn.sigmoid(i), jax.nn.sigmoid(o)
            c_tmp = jnp.tanh(c_tmp)
            c = f * c_adj + i * c_tmp
            h = o * jnp.tanh(c)
            outs.append(h)
        return jnp.stack(outs, 1), h, c

    ref_out, ref_h, ref_c = reference(inputs, timestamps, params)
    # bf16 matmul operands with f32 accumulation -> slightly relaxed tolerance.
    tol = 2e-2
    assert jnp.allclose(outputs, ref_out, atol=tol, rtol=tol), \
        float(jnp.max(jnp.abs(outputs - ref_out)))
    assert jnp.allclose(h_last, ref_h, atol=tol, rtol=tol), \
        float(jnp.max(jnp.abs(h_last - ref_h)))
    assert jnp.allclose(c_last, ref_c, atol=tol, rtol=tol), \
        float(jnp.max(jnp.abs(c_last - ref_c)))

    print("KERNEL_OK")
</pallas_src>

<mosaic_0001>
module attributes {stable_mosaic.version = 11 : i64} {
  func.func @_time_lstm_kernel(%arg0: i32, %arg1: i32, %arg2: memref<1x8x512xbf16, #tpu.memory_space<vmem>>, %arg3: memref<1x8x1xf32, #tpu.memory_space<vmem>>, %arg4: memref<8x128xf32, #tpu.memory_space<vmem>>, %arg5: memref<8x128xf32, #tpu.memory_space<vmem>>, %arg6: memref<128x128xbf16, #tpu.memory_space<vmem>>, %arg7: memref<1x128xf32, #tpu.memory_space<vmem>>, %arg8: memref<128x512xbf16, #tpu.memory_space<vmem>>, %arg9: memref<1x8x128xf32, #tpu.memory_space<vmem>>, %arg10: memref<8x128xf32, #tpu.memory_space<vmem>>, %arg11: memref<8x128xf32, #tpu.memory_space<vmem>>, %arg12: memref<8x128xf32, #tpu.memory_space<vmem>>, %arg13: memref<8x128xf32, #tpu.memory_space<vmem>>) attributes {dimension_semantics = [#tpu.dimension_semantics<parallel>, #tpu.dimension_semantics<arbitrary>], iteration_bounds = array<i64: 1, 8>, scalar_prefetch = 0 : i64, scratch_operands = 2 : i64, tpu.core_type = #tpu.core_type<tc>, window_params = [{transform_indices = @transform_0, window_bounds = array<i64: 1, 8, 512>}, {transform_indices = @transform_1, window_bounds = array<i64: 1, 8, 1>}, {transform_indices = @transform_2, window_bounds = array<i64: 8, 128>}, {transform_indices = @transform_3, window_bounds = array<i64: 8, 128>}, {pipeline_mode = #tpu.pipeline_mode<synchronous>, transform_indices = @transform_4, window_bounds = array<i64: 128, 128>}, {pipeline_mode = #tpu.pipeline_mode<synchronous>, transform_indices = @transform_5, window_bounds = array<i64: 1, 128>}, {pipeline_mode = #tpu.pipeline_mode<synchronous>, transform_indices = @transform_6, window_bounds = array<i64: 128, 512>}, {transform_indices = @transform_7, window_bounds = array<i64: 1, 8, 128>}, {transform_indices = @transform_8, window_bounds = array<i64: 8, 128>}, {transform_indices = @transform_9, window_bounds = array<i64: 8, 128>}]} {
    %c0_i32 = arith.constant 0 : i32
    %0 = arith.cmpi eq, %arg1, %c0_i32 : i32
    %1 = arith.extui %0 : i1 to i32
    %c0_i32_0 = arith.constant 0 : i32
    %2 = arith.cmpi ne, %1, %c0_i32_0 : i32
    scf.if %2 {
      %c0_28 = arith.constant 0 : index
      %c0_29 = arith.constant 0 : index
      %58 = vector.load %arg4[%c0_28, %c0_29] : memref<8x128xf32, #tpu.memory_space<vmem>>, vector<8x128xf32>
      %c0_30 = arith.constant 0 : index
      %c0_31 = arith.constant 0 : index
      %59 = vector.load %arg12[%c0_30, %c0_31] : memref<8x128xf32, #tpu.memory_space<vmem>>, vector<8x128xf32>
      tpu.vector_store %arg12[%c0_30, %c0_31], %58 {strides = array<i32>} : memref<8x128xf32, #tpu.memory_space<vmem>>, vector<8x128xf32>,
      %c0_32 = arith.constant 0 : index
      %c0_33 = arith.constant 0 : index
      %60 = vector.load %arg5[%c0_32, %c0_33] : memref<8x128xf32, #tpu.memory_space<vmem>>, vector<8x128xf32>
      %c0_34 = arith.constant 0 : index
      %c0_35 = arith.constant 0 : index
      %61 = vector.load %arg13[%c0_34, %c0_35] : memref<8x128xf32, #tpu.memory_space<vmem>>, vector<8x128xf32>
      tpu.vector_store %arg13[%c0_34, %c0_35], %60 {strides = array<i32>} : memref<8x128xf32, #tpu.memory_space<vmem>>, vector<8x128xf32>,
    } else {
    }
    %c0 = arith.constant 0 : index
    %c0_1 = arith.constant 0 : index
    %3 = vector.load %arg12[%c0, %c0_1] : memref<8x128xf32, #tpu.memory_space<vmem>>, vector<8x128xf32>
    %c0_2 = arith.constant 0 : index
    %c0_3 = arith.constant 0 : index
    %4 = vector.load %arg13[%c0_2, %c0_3] : memref<8x128xf32, #tpu.memory_space<vmem>>, vector<8x128xf32>
    %5 = arith.truncf %4 : vector<8x128xf32> to vector<8x128xbf16>
    %c0_4 = arith.constant 0 : index
    %c0_5 = arith.constant 0 : index
    %6 = vector.load %arg6[%c0_4, %c0_5] : memref<128x128xbf16, #tpu.memory_space<vmem>>, vector<128x128xbf16>
    %cst = arith.constant dense<0.000000e+00> : vector<8x128xf32>
    %7 = tpu.matmul %5, %6, %cst {dimension_numbers = #tpu.dot_dimension_numbers<[1], [0], [0], [1], [0, 0, 1, 1], [], []>} : vector<8x128xbf16>, vector<128x128xbf16>, vector<8x128xf32> -> vector<8x128xf32>
    %c0_6 = arith.constant 0 : index
    %c0_7 = arith.constant 0 : index
    %8 = vector.load %arg7[%c0_6, %c0_7] : memref<1x128xf32, #tpu.memory_space<vmem>>, vector<1x128xf32>
    %9 = vector.broadcast %8 : vector<1x128xf32> to vector<8x128xf32>
    %10 = arith.addf %7, %9 : vector<8x128xf32>
    %11 = math.tanh %10 : vector<8x128xf32>
    %c0_8 = arith.constant 0 : index
    %c0_9 = arith.constant 0 : index
    %c0_10 = arith.constant 0 : index
    %12 = vector.load %arg3[%c0_8, %c0_9, %c0_10] : memref<1x8x1xf32, #tpu.memory_space<vmem>>, vector<1x8x1xf32>
    %13 = vector.shape_cast %12 : vector<1x8x1xf32> to vector<8x1xf32>
    %14 = arith.subf %4, %11 : vector<8x128xf32>
    %15 = vector.broadcast %13 : vector<8x1xf32> to vector<8x128xf32>
    %16 = arith.mulf %11, %15 : vector<8x128xf32>
    %17 = arith.addf %14, %16 : vector<8x128xf32>
    %18 = arith.truncf %3 : vector<8x128xf32> to vector<8x128xbf16>
    %c0_11 = arith.constant 0 : index
    %c0_12 = arith.constant 0 : index
    %19 = vector.load %arg8[%c0_11, %c0_12] : memref<128x512xbf16, #tpu.memory_space<vmem>>, vector<128x512xbf16>
    %cst_13 = arith.constant dense<0.000000e+00> : vector<8x512xf32>
    %20 = tpu.matmul %18, %19, %cst_13 {dimension_numbers = #tpu.dot_dimension_numbers<[1], [0], [0], [1], [0, 0, 1, 1], [], []>} : vector<8x128xbf16>, vector<128x512xbf16>, vector<8x512xf32> -> vector<8x512xf32>
    %c0_14 = arith.constant 0 : index
    %c0_15 = arith.constant 0 : index
    %c0_16 = arith.constant 0 : index
    %21 = vector.load %arg2[%c0_14, %c0_15, %c0_16] : memref<1x8x512xbf16, #tpu.memory_space<vmem>>, vector<1x8x512xbf16>
    %22 = vector.shape_cast %21 : vector<1x8x512xbf16> to vector<8x512xbf16>
    %23 = arith.extf %22 : vector<8x512xbf16> to vector<8x512xf32>
    %24 = arith.addf %20, %23 : vector<8x512xf32>
    %25 = vector.extract_strided_slice %24 {offsets = [0, 0], sizes = [8, 128], strides = [1, 1]} : vector<8x512xf32> to vector<8x128xf32>
    %26 = arith.negf %25 : vector<8x128xf32>
    %27 = math.exp %26 : vector<8x128xf32>
    %cst_17 = arith.constant 1.000000e+00 : f32
    %28 = vector.broadcast %cst_17 : f32 to vector<8x128xf32>
    %29 = arith.addf %28, %27 : vector<8x128xf32>
    %30 = arith.divf %28, %29 : vector<8x128xf32>
    %31 = vector.extract_strided_slice %24 {offsets = [0, 128], sizes = [8, 128], strides = [1, 1]} : vector<8x512xf32> to vector<8x128xf32>
    %32 = arith.negf %31 : vector<8x128xf32>
    %33 = math.exp %32 : vector<8x128xf32>
    %cst_18 = arith.constant 1.000000e+00 : f32
    %34 = vector.broadcast %cst_18 : f32 to vector<8x128xf32>
    %35 = arith.addf %34, %33 : vector<8x128xf32>
    %36 = arith.divf %34, %35 : vector<8x128xf32>
    %37 = vector.extract_strided_slice %24 {offsets = [0, 256], sizes = [8, 128], strides = [1, 1]} : vector<8x512xf32> to vector<8x128xf32>
    %38 = arith.negf %37 : vector<8x128xf32>
    %39 = math.exp %38 : vector<8x128xf32>
    %cst_19 = arith.constant 1.000000e+00 : f32
    %40 = vector.broadcast %cst_19 : f32 to vector<8x128xf32>
    %41 = arith.addf %40, %39 : vector<8x128xf32>
    %42 = arith.divf %40, %41 : vector<8x128xf32>
    %43 = vector.extract_strided_slice %24 {offsets = [0, 384], sizes = [8, 128], strides = [1, 1]} : vector<8x512xf32> to vector<8x128xf32>
    %44 = math.tanh %43 : vector<8x128xf32>
    %45 = arith.mulf %30, %17 : vector<8x128xf32>
    %46 = arith.mulf %36, %44 : vector<8x128xf32>
    %47 = arith.addf %45, %46 : vector<8x128xf32>
    %48 = math.tanh %47 : vector<8x128xf32>
    %49 = arith.mulf %42, %48 : vector<8x128xf32>
    %c0_20 = arith.constant 0 : index
    %c0_21 = arith.constant 0 : index
    %50 = vector.load %arg12[%c0_20, %c0_21] : memref<8x128xf32, #tpu.memory_space<vmem>>, vector<8x128xf32>
    tpu.vector_store %arg12[%c0_20, %c0_21], %49 {strides = array<i32>} : memref<8x128xf32, #tpu.memory_space<vmem>>, vector<8x128xf32>,
    %c0_22 = arith.constant 0 : index
    %c0_23 = arith.constant 0 : index
    %51 = vector.load %arg13[%c0_22, %c0_23] : memref<8x128xf32, #tpu.memory_space<vmem>>, vector<8x128xf32>
    tpu.vector_store %arg13[%c0_22, %c0_23], %47 {strides = array<i32>} : memref<8x128xf32, #tpu.memory_space<vmem>>, vector<8x128xf32>,
    %c0_24 = arith.constant 0 : index
    %c0_25 = arith.constant 0 : index
    %c0_26 = arith.constant 0 : index
    %52 = vector.load %arg9[%c0_24, %c0_25, %c0_26] : memref<1x8x128xf32, #tpu.memory_space<vmem>>, vector<1x8x128xf32>
    %53 = vector.shape_cast %52 : vector<1x8x128xf32> to vector<8x128xf32>
    %54 = vector.shape_cast %49 : vector<8x128xf32> to vector<1x8x128xf32>
    tpu.vector_store %arg9[%c0_24, %c0_25, %c0_26], %54 {strides = array<i32>} : memref<1x8x128xf32, #tpu.memory_space<vmem>>, vector<1x8x128xf32>,
    %c7_i32 = arith.constant 7 : i32
    %55 = arith.cmpi eq, %arg1, %c7_i32 : i32
    %56 = arith.extui %55 : i1 to i32
    %c0_i32_27 = arith.constant 0 : i32
    %57 = arith.cmpi ne, %56, %c0_i32_27 : i32
    scf.if %57 {
      %c0_28 = arith.constant 0 : index
      %c0_29 = arith.constant 0 : index
      %58 = vector.load %arg10[%c0_28, %c0_29] : memref<8x128xf32, #tpu.memory_space<vmem>>, vector<8x128xf32>
      tpu.vector_store %arg10[%c0_28, %c0_29], %49 {strides = array<i32>} : memref<8x128xf32, #tpu.memory_space<vmem>>, vector<8x128xf32>,
      %c0_30 = arith.constant 0 : index
      %c0_31 = arith.constant 0 : index
      %59 = vector.load %arg11[%c0_30, %c0_31] : memref<8x128xf32, #tpu.memory_space<vmem>>, vector<8x128xf32>
      tpu.vector_store %arg11[%c0_30, %c0_31], %47 {strides = array<i32>} : memref<8x128xf32, #tpu.memory_space<vmem>>, vector<8x128xf32>,
    } else {
    }
    return
  }
  func.func @transform_0(%arg0: i32, %arg1: i32) -> (i32, i32, i32) {
    %c0_i32 = arith.constant 0 : i32
    %c0_i32_0 = arith.constant 0 : i32
    return %arg1, %arg0, %c0_i32 : i32, i32, i32
  }
  func.func @transform_1(%arg0: i32, %arg1: i32) -> (i32, i32, i32) {
    %c0_i32 = arith.constant 0 : i32
    %c0_i32_0 = arith.constant 0 : i32
    return %arg1, %arg0, %c0_i32 : i32, i32, i32
  }
  func.func @transform_2(%arg0: i32, %arg1: i32) -> (i32, i32) {
    %c0_i32 = arith.constant 0 : i32
    %c0_i32_0 = arith.constant 0 : i32
    return %arg0, %c0_i32 : i32, i32
  }
  func.func @transform_3(%arg0: i32, %arg1: i32) -> (i32, i32) {
    %c0_i32 = arith.constant 0 : i32
    %c0_i32_0 = arith.constant 0 : i32
    return %arg0, %c0_i32 : i32, i32
  }
  func.func @transform_4(%arg0: i32, %arg1: i32) -> (i32, i32) {
    %c0_i32 = arith.constant 0 : i32
    %c0_i32_0 = arith.constant 0 : i32
    %c0_i32_1 = arith.constant 0 : i32
    return %c0_i32, %c0_i32_0 : i32, i32
  }
  func.func @transform_5(%arg0: i32, %arg1: i32) -> (i32, i32) {
    %c0_i32 = arith.constant 0 : i32
    %c0_i32_0 = arith.constant 0 : i32
    %c0_i32_1 = arith.constant 0 : i32
    return %c0_i32, %c0_i32_0 : i32, i32
  }
  func.func @transform_6(%arg0: i32, %arg1: i32) -> (i32, i32) {
    %c0_i32 = arith.constant 0 : i32
    %c0_i32_0 = arith.constant 0 : i32
    %c0_i32_1 = arith.constant 0 : i32
    return %c0_i32, %c0_i32_0 : i32, i32
  }
  func.func @transform_7(%arg0: i32, %arg1: i32) -> (i32, i32, i32) {
    %c0_i32 = arith.constant 0 : i32
    %c0_i32_0 = arith.constant 0 : i32
    return %arg1, %arg0, %c0_i32 : i32, i32, i32
  }
  func.func @transform_8(%arg0: i32, %arg1: i32) -> (i32, i32) {
    %c0_i32 = arith.constant 0 : i32
    %c0_i32_0 = arith.constant 0 : i32
    return %arg0, %c0_i32 : i32, i32
  }
  func.func @transform_9(%arg0: i32, %arg1: i32) -> (i32, i32) {
    %c0_i32 = arith.constant 0 : i32
    %c0_i32_0 = arith.constant 0 : i32
    return %arg0, %c0_i32 : i32, i32
  }
}

</mosaic_0001>

<bundles_post_ra>
// kernel: tpu_custom_call.1
= control target key start
LH: loop header
LB: loop body
LE: loop exit
PB: predicated region body
PF: predicated region fallthrough
CT: control target
= control target key end

     0   :  { %s1898_s0 = inlined_call_operand.hbm [shape: bf16[8,8,512], index: 0, kind: input, shape index: {}]   ;;  %s1899_s1 = inlined_call_operand.vmem [shape: f32[8,8,1], index: 1, kind: input, shape index: {}]   ;;  %s1900_s2 = inlined_call_operand.vmem [shape: f32[8,128], index: 2, kind: input, shape index: {}]   ;;  %s1901_s3 = inlined_call_operand.hbm [shape: f32[8,128], index: 3, kind: input, shape index: {}]   ;;  %s1902_s4 = inlined_call_operand.vmem [shape: bf16[128,128], index: 4, kind: input, shape index: {}]   ;;  %s1903_s5 = inlined_call_operand.vmem [shape: f32[1,128], index: 5, kind: input, shape index: {}]   ;;  %s1904_s6 = inlined_call_operand.hbm [shape: bf16[128,512], index: 6, kind: input, shape index: {}]   ;;  %s1905_s7 = inlined_call_operand.hbm [shape: f32[8,8,128], index: 7, kind: output, shape index: {0}]   ;;  %s1906_s8 = inlined_call_operand.hbm [shape: f32[8,128], index: 8, kind: output, shape index: {1}]   ;;  %s1907_s9 = inlined_call_operand.hbm [shape: f32[8,128], index: 9, kind: output, shape index: {2}]  }
   0x1   :  { %1917 = sst [smem:[#allocation22_spill]] %s1901_s3 }
   0x2   :  { %1918 = sst [smem:[#allocation23_spill]] %s1904_s6 }
   0x3   :  { %15 = vsyncpa [#allocation5], 0 }
   0x4   :  { %17 = vsyncpa [#allocation5 + $0x1], 0 }
   0x5   :  { %18 = vsyncpa [#allocation8], 0 }
   0x6   :  { %19 = vsyncpa [#allocation6], 0 }
   0x7   :  { %21 = vsyncpa [#allocation6 + $0x1], 0 }
   0x8   :  { %22 = vsyncpa [#allocation12], 0  ;;  %s1654_s30 = smov 0   ;;  %s1656_s10 = smov 0  }
   0x9   :  { %s1658_s11 = smov 0   ;;  %s1660_s12 = smov 0  }
   0xa   :  { %s1662_s13 = smov 0   ;;  %s1664_s14 = smov 0  }
   0xb LB: > { %1919 = sst [smem:[#allocation18_spill]] %s1571_s30  ;;  %s1098_s15 = sadd.s32 4294967295, %s1591_s14   ;;  %s1591_s14 = sphi %s1664_s14, %s28_s14   ;;  %s1587_s13 = sphi %s1662_s13, %s1942_s13   ;;  %s1583_s12 = sphi %s1660_s12, %s1941_s12   ;;  %s1579_s11 = sphi %s1658_s11, %s1945_s11   ;;  %s1575_s10 = sphi %s1656_s10, %s1944_s10   ;;  %s1571_s30 = sphi %s1654_s30, %s1943_s30  }
   0xc   : > { %1920 = sst [smem:[#allocation19_spill]] %s1587_s13  ;;  %s1099_s16 = sadd.s32 4294967294, %s1591_s14  }
   0xd   : > { %p62_p0 = scmp.ne.s32.totalorder %s1575_s10, %s1571_s30  ;;  %p1688_p1 = scmp.eq.s32.totalorder %s1098_s15, 0 }
   0xe   : > { %p1692_p2 = scmp.eq.s32.totalorder %s1098_s15, 7  ;;  %p237_p3 = scmp.eq.s32.totalorder %s1099_s16, 7 }
   0xf   : > { %s1921_s17 = scalar_select %p1688_p1, 1, 0 }
  0x10   : > { %s1922_s18 = scalar_select %p1692_p2, 1, 0 }
  0x11   : > { %p1698_p4 = por %p1688_p1, %p62_p0  ;;  %p1100_p5 = scmp.ge.s32.totalorder %s1591_s14, 1 }
  0x12   : > { %p1703_p6 = por %p237_p3, %p62_p0  ;;  %p296_p7 = scmp.lt.s32.totalorder %s1591_s14, 9 }
  0x13   : > { %s1923_s19 = scalar_select %p1698_p4, 1, 0 }
  0x14   : > { %s1924_s20 = scalar_select %p1703_p6, 1, 0 }
  0x15   : > { %p1708_p8 = pnand %p1100_p5, %p296_p7  ;;  %s1593_s22 = smov [#allocation7]  }
  0x16   : > { %1925 = sst [smem:[#allocation20_spill]] %s1924_s20  ;;  %s318_s23 = sshll.u32 %s1593_s22, 4  ;;  %s319_s23 = int_to_ptr.vmem [resolvable:$true] %s318_s23 }
  0x17   : > { %s1926_s21 = scalar_select %p1708_p8, 1, 0 }
  0x18   : > { %p1218_p9 = pneg %p1708_p8  ;;  %s1594_s24 = smov [#allocation9]  }
  0x19   : > { %s334_s25 = sshll.u32 %s1594_s24, 4  ;;  %s1386_s27 = scalar_lea.vmem %s319_s23, 128  ;;  %s335_s25 = int_to_ptr.vmem [resolvable:$true] %s334_s25 }
  0x1a   : > { %p1716_p10 = pnand %p1218_p9, %p1688_p1  ;;  %p1387_p12 = scmp.ne.s32.totalorder %s319_s23, %s1386_s27 }
  0x1b   : > { %p1394_p3 = scmp.lt.s32.totalorder %s319_s23, %s319_s23  ;;  %p1395_p5 = scmp.lt.s32.totalorder %s1386_s27, %s1386_s27 }
  0x1c   : > { %p1377_p11 = pneg %p1716_p10 }
  0x1d   : > { %p1396_p7 = por %p1395_p5, %p1394_p3 }
  0x1e   : > { %p1389_p13 = pnand %p1387_p12, %p1377_p11 }
  0x20   : > { %p1390_p0 = pneg %p1389_p13 }
  0x22   : > { %p1397_p6 = pnand %p1396_p7, %p1390_p0 }
  0x24   : > { %1400 = shalt.err (!%p1397_p6)
}
  0x25   : > { %s1928_s3 = sld [smem:[#allocation22_spill]]  ;;  %s1412_s15 = scalar_lea.vmem %s335_s25, 4096 }
  0x26   : > { %p1413_p9 = scmp.ne.s32.totalorder %s335_s25, %s1412_s15  ;;  %p1420_p12 = scmp.lt.s32.totalorder %s335_s25, %s335_s25 }
  0x27   : > { %p1421_p13 = scmp.lt.s32.totalorder %s1412_s15, %s1412_s15 }
  0x28   : > { %p1415_p1 = pnand %p1413_p9, %p1377_p11 }
  0x29   : > { %p1422_p8 = por %p1421_p13, %p1420_p12 }
  0x2a   : > { %p1416_p4 = pneg %p1415_p1 }
  0x2b   : > { %1221 = dma.hbm_to_vmem [thread:$0]  (!%p1716_p10), %s1928_s3, 128, %s319_s23, [#allocation8]  }
  0x2c   : > { %p1423_p2 = pnand %p1422_p8, %p1416_p4 }
  0x2e   : > { %1426 = shalt.err (!%p1423_p2)
}
  0x2f   : > { %s1595_s16 = smov 256   ;;  %s1596_s22 = smov 16  }
  0x30   : > { %s1929_s6 = sld [smem:[#allocation23_spill]]  ;;  %s37_s27 = sadd.s32 1, %s1587_s13 }
  0x31   : > { %s49_s28 = sadd.s32 1, %s1579_s11  ;;  %p38_p1 = scmp.ge.s32.totalorder %s37_s27, 8 }
  0x32   : > { %p56_p2 = scmp.ne.s32.totalorder %s1579_s11, %s1575_s10  ;;  %p57_p4 = scmp.eq.s32.totalorder %s1591_s14, 0 }
  0x33   : > { %p1235_p6 = scmp.lt.s32.totalorder %s1591_s14, 8  ;;  %s1947_s27 = smov (%p38_p1, %s37_s27), 0 }
  0x34   : > { %1930 = sst [smem:[#allocation21_spill]] %s1947_s27  ;;  %p58_p8 = por %p57_p4, %p56_p2 }
  0x35   : > { %p1931_p11 = scmp.ne.s32.totalorder %s1922_s18, 0  ;;  %s44_s26 = ssub.s32 %s1587_s13, %s1947_s27 }
  0x36   : > { %1224 = dma.hbm_to_vmem [thread:$0]  (!%p1716_p10), %s1929_s6, 4096, %s335_s25, [#allocation8], %s1595_s16, %s1595_s16, %s1596_s22  }
  0x37   : > { %p1748_p0 = por %p1931_p11, %p56_p2  ;;  %s348_s15 = sand.u32 1, %s1579_s11  }
  0x38   : > { %p47_p3 = scmp.eq.s32.totalorder %s44_s26, 0  ;;  %s1105_s25 = sshll.u32 %s348_s15, 4 }
  0x39   : > { %s1168_s16 = sshll.u32 %s1587_s13, 8  ;;  %s352_s6 = scalar_lea.vmem [#allocation4], %s1105_s25 }
  0x3a   : > { %s1757_s22 = scalar_select %p47_p3, %s1579_s11, %s49_s28  }
  0x3b   : > { %s360_s3 = scalar_lea.hbm %s1898_s0, %s1168_s16  ;;  %s362_s20 = sshll.u32 %s352_s6, 4  ;;  %s363_s20 = int_to_ptr.vmem [resolvable:$true] %s362_s20 }
  0x3c   : > { %p1764_p10 = pnand %p1235_p6, %p58_p8  ;;  %s349_s27 = scalar_lea.sflag [#allocation5], %s348_s15 }
  0x3d   : > { %s1440_s26 = scalar_lea.vmem %s363_s20, 256  ;;  %s1597_s28 = smov [#allocation4]  }
  0x3e   : > { %p1429_p5 = pneg %p1764_p10  ;;  %p1441_p7 = scmp.ne.s32.totalorder %s363_s20, %s1440_s26 }
  0x3f   : > { %s1445_s13 = sshll.u32 %s1597_s28, 4  ;;  %s1446_s13 = int_to_ptr.vmem [resolvable:$false] %s1445_s13 }
  0x40   : > { %p1443_p9 = pnand %p1441_p7, %p1429_p5  ;;  %s1447_s16 = scalar_lea.vmem %s1446_s13, 512 }
  0x41   : > { %p1448_p13 = scmp.lt.s32.totalorder %s363_s20, %s1446_s13  ;;  %p1449_p1 = scmp.lt.s32.totalorder %s1447_s16, %s1440_s26 }
  0x42   : > { %p1444_p12 = pneg %p1443_p9 }
  0x43   : > { %p1450_p2 = por %p1449_p1, %p1448_p13 }
  0x45   : > { %p1451_p4 = pnand %p1450_p2, %p1444_p12 }
  0x47   : > { %1454 = shalt.err (!%p1451_p4)
}
  0x48   : > { %1228 = dma.hbm_to_vmem [thread:$0]  (!%p1764_p10), %s360_s3, 256, %s363_s20, %s349_s27  }
  0x49   : > { %p1934_p6 = scmp.ne.s32.totalorder %s1926_s21, 0 }
  0x4a   : > { %s1775_s6 = sand.u32 (!%p1934_p6), 1, %s1575_s10   ;;  %p1935_p8 = scmp.ne.s32.totalorder (!%p1934_p6), %s1923_s19, 0 }
  0x4b   : > { %381 = sbr.rel (%p1934_p6) target bundleno = 444 (0x1bc), region = 48  ;;  %s1109_s15 = sshll.u32 (!%p1934_p6), %s1775_s6, 4 }
  0x4c   : > { %s384_s25 = scalar_lea.sflag (!%p1934_p6), [#allocation5], %s1775_s6  ;;  %s1779_s23 = scalar_lea.vmem (!%p1934_p6), [#allocation4], %s1109_s15 }
  0x50   : > { %1554 = dma.done.wait (%p1935_p8), %s384_s25, 256  }
  0x51   : > { %1556 = vsyncadd (%p1935_p8), %s384_s25, 4294967040  ;;  %p1936_p11 = scmp.ne.s32.totalorder %s1921_s17, 0 }
  0x53   : > { %1558 = dma.done.wait (%p1936_p11), [#allocation8], 4224  }
  0x54   : > { %1560 = vsyncadd (%p1936_p11), [#allocation8], 4294963072  ;;  %s1112_s3 = sshll.u32 %s1775_s6, 3  ;;  %p441_p3 = scmp.lt.s32.totalorder %s1583_s12, 7 }
  0x55   : > { %s1797_s19 = scalar_lea.vmem [#allocation10], %s1112_s3  ;;  %p1114_p10 = scmp.ne.s32.totalorder %s1583_s12, 0 }
  0x56   : > { %s442_s30 = scalar_select %p441_p3, %s1583_s12, 7 }
  0x57   : > { %456 = sbr.rel (%p1114_p10) target bundleno = 94 (0x5e), region = 64 }
  0x58   : > { %s1113_s13 = sshll.u32 %s442_s30, 3 }
  0x59   : > { %s1795_s27 = scalar_lea.vmem %s1899_s1, %s1113_s13 }
  0x5c   : > { %v457_v0 = vld [vmem:[%s1900_s2] sm:$0xff]  ;;  %v459_v1 = vld [vmem:[#allocation7] sm:$0xff] }
  0x5d   : > { %458 = vst [vmem:[#allocation2] sm:$0xff] %v457_v0  ;;  %460 = vst [vmem:[#allocation3] sm:$0xff] %v459_v1 }
  0x5e PF: > { %v1301_v2 = vld [vmem:[%s1902_s4 + $0x38] sm:$0xff]   ;;  %v1598_v3 = vmov 0.0   ;;  %vm1599_vm0 = vmmov 0   ;;  %v1305_v6 = vld [vmem:[%s1902_s4 + $0x30] sm:$0xff]   ;;  %v1600_v9 = vmov 0   ;;  %v1309_v10 = vld [vmem:[%s1902_s4 + $0x28] sm:$0xff]  }
  0x5f   : > { %1178 = vmatprep.subr.bf16.mxu0 %v1598_v3  ;;  %v1302_v4 = vld [vmem:[#allocation9 + $0xe4] ss:$16 sps:$4 sm:$0xff]   ;;  %v1304_v5 = vld [vmem:[#allocation9 + $0xe0] ss:$16 sps:$4 sm:$0xff]   ;;  %1194 = vmatprep.mubr.msk.bf16.mxu0 %vm1599_vm0, %v1598_v3  ;;  %v1313_v14 = vld [vmem:[%s1902_s4 + $0x20] sm:$0xff]   ;;  %p1159_p5 = scmp.ne.s32.totalorder %s1583_s12, 7 }
  0x60   : > { %1179 = vmatpush3.bf16.msra.mxu0 %v1301_v2  ;;  %784 = vmatprep.subr.bf16.mxu1 %v1302_v4  ;;  %v1306_v7 = vld [vmem:[#allocation9 + $0xc4] ss:$16 sps:$4 sm:$0xff]   ;;  %v1308_v8 = vld [vmem:[#allocation9 + $0xc0] ss:$16 sps:$4 sm:$0xff]   ;;  %v1321_v20 = vld [vmem:[%s1902_s4 + $0x10] sm:$0xff]  }
  0x61   : > { %1180 = vmatprep.subr.bf16.mxu0 %v1598_v3  ;;  %785 = vmatpush1.bf16.msra.mxu1 %v1304_v5  ;;  %v1310_v11 = vld [vmem:[#allocation9 + $0xa4] ss:$16 sps:$4 sm:$0xff]   ;;  %v1312_v12 = vld [vmem:[#allocation9 + $0xa0] ss:$16 sps:$4 sm:$0xff]   ;;  %v1329_v25 = vld [vmem:[%s1902_s4] sm:$0xff]  }
  0x62   : > { %816 = vmatprep.mubr.bf16.mxu1 %v1600_v9  ;;  %1300 = vset.pattern.permute.xlu0 %v1600_v9  ;;  %v1314_v13 = vld [vmem:[#allocation9 + $0x84] ss:$16 sps:$4 sm:$0xff]   ;;  %v1316_v15 = vld [vmem:[#allocation9 + $0x80] ss:$16 sps:$4 sm:$0xff]   ;;  %v1335_v28 = vld [vmem:[#allocation9 + $0xec] ss:$16 sps:$4 sm:$0xff]  }
  0x63   : > { %786 = vmatprep.subr.bf16.mxu1 %v1306_v7  ;;  %v1318_v16 = vld [vmem:[#allocation9 + $0x64] ss:$16 sps:$4 sm:$0xff]   ;;  %v1320_v18 = vld [vmem:[#allocation9 + $0x60] ss:$16 sps:$4 sm:$0xff]   ;;  %v1333_v32 = vld [vmem:[#allocation9 + $0xe8] ss:$16 sps:$4 sm:$0xff]  }
  0x64   : > { %1181 = vmatpush3.bf16.msra.mxu0 %v1305_v6  ;;  %v1317_v17 = vld [vmem:[%s1902_s4 + $0x18] sm:$0xff]   ;;  %v1325_v23 = vld [vmem:[%s1902_s4 + $0x8] sm:$0xff]   ;;  %v461_v30 = vld [vmem:[#allocation2] sm:$0xff] }
  0x65   : > { %1182 = vmatprep.subr.bf16.mxu0 %v1598_v3  ;;  %787 = vmatpush1.bf16.msra.mxu1 %v1308_v8  ;;  %v1322_v19 = vld [vmem:[#allocation9 + $0x44] ss:$16 sps:$4 sm:$0xff]   ;;  %v1324_v21 = vld [vmem:[#allocation9 + $0x40] ss:$16 sps:$4 sm:$0xff]   ;;  %v576_v33 = vld [vmem:[%s1795_s27] sm:$0xff]  ;;  %v585_v34 = vpack.c.bf16 %v461_v30, %v461_v30 }
  0x66   : > { %788 = vmatprep.subr.bf16.mxu1 %v1310_v11  ;;  %v1326_v22 = vld [vmem:[#allocation9 + $0x24] ss:$16 sps:$4 sm:$0xff]   ;;  %v1328_v24 = vld [vmem:[#allocation9 + $0x20] ss:$16 sps:$4 sm:$0xff]   ;;  %v1338_v35 = vld [vmem:[#allocation9 + $0xcc] ss:$16 sps:$4 sm:$0xff]   ;;  %580 = vperm.xlu0 %1300, %v576_v33  }
  0x67   : > { %v1330_v26 = vld [vmem:[#allocation9 + $0x4] ss:$16 sps:$4 sm:$0xff]   ;;  %v1332_v29 = vld [vmem:[#allocation9] ss:$16 sps:$4 sm:$0xff]   ;;  %v1336_v36 = vld [vmem:[#allocation9 + $0xc8] ss:$16 sps:$4 sm:$0xff]  }
  0x68   : > { %1183 = vmatpush3.bf16.msra.mxu0 %v1309_v10  ;;  %v1827_v27 = vld [vmem:[#allocation3] sm:$0xff]  ;;  %v1341_v37 = vld [vmem:[#allocation9 + $0xac] ss:$16 sps:$4 sm:$0xff]   ;;  %v1339_v38 = vld [vmem:[#allocation9 + $0xa8] ss:$16 sps:$4 sm:$0xff]  }
  0x69   : > { %1184 = vmatprep.subr.bf16.mxu0 %v1598_v3  ;;  %789 = vmatpush1.bf16.msra.mxu1 %v1312_v12  ;;  %v463_v31 = vpack.c.bf16 %v1827_v27, %v1827_v27  ;;  %v1344_v39 = vld [vmem:[#allocation9 + $0x8c] ss:$16 sps:$4 sm:$0xff]   ;;  %v1342_v40 = vld [vmem:[#allocation9 + $0x88] ss:$16 sps:$4 sm:$0xff]   ;;  %v619_v2 = vld [vmem:[%s1779_s23 + $0x8] sm:$0xff] }
  0x6a   : > { %790 = vmatprep.subr.bf16.mxu1 %v1314_v13  ;;  %v1347_v41 = vld [vmem:[#allocation9 + $0x6c] ss:$16 sps:$4 sm:$0xff]   ;;  %v1345_v42 = vld [vmem:[#allocation9 + $0x68] ss:$16 sps:$4 sm:$0xff]   ;;  %v622_v5 = vunpack.c.l.bf16 %v619_v2  ;;  %v623_v7 = vunpack.c.h.bf16 %v619_v2 }
  0x6b   : > { %v1350_v43 = vld [vmem:[#allocation9 + $0x4c] ss:$16 sps:$4 sm:$0xff]   ;;  %v1348_v44 = vld [vmem:[#allocation9 + $0x48] ss:$16 sps:$4 sm:$0xff]  }
  0x6c   : > { %1185 = vmatpush3.bf16.msra.mxu0 %v1313_v14  ;;  %v1353_v45 = vld [vmem:[#allocation9 + $0x2c] ss:$16 sps:$4 sm:$0xff]   ;;  %v1351_v46 = vld [vmem:[#allocation9 + $0x28] ss:$16 sps:$4 sm:$0xff]  }
  0x6d   : > { %1186 = vmatprep.subr.bf16.mxu0 %v1598_v3  ;;  %791 = vmatpush1.bf16.msra.mxu1 %v1316_v15  ;;  %v1356_v47 = vld [vmem:[#allocation9 + $0xc] ss:$16 sps:$4 sm:$0xff]   ;;  %v1354_v48 = vld [vmem:[#allocation9 + $0x8] ss:$16 sps:$4 sm:$0xff]  }
  0x6e   : > { %792 = vmatprep.subr.bf16.mxu1 %v1318_v16  ;;  %v618_v50 = vld [vmem:[%s1779_s23] sm:$0xff] }
  0x6f   : > { %v620_v53 = vunpack.c.l.bf16 %v618_v50  ;;  %v621_v55 = vunpack.c.h.bf16 %v618_v50  ;;  %v1115_v0 = vld [vmem:[%s1903_s5] ss:$0 sm:$0xff] }
  0x70   : > { %1187 = vmatpush3.bf16.msra.mxu0 %v1317_v17 }
  0x71   : > { %1188 = vmatprep.subr.bf16.mxu0 %v1598_v3  ;;  %793 = vmatpush1.bf16.msra.mxu1 %v1320_v18 }
  0x72   : > { %794 = vmatprep.subr.bf16.mxu1 %v1322_v19 }
  0x74   : > { %1189 = vmatpush3.bf16.msra.mxu0 %v1321_v20 }
  0x75   : > { %1190 = vmatprep.subr.bf16.mxu0 %v1598_v3  ;;  %795 = vmatpush1.bf16.msra.mxu1 %v1324_v21 }
  0x76   : > { %796 = vmatprep.subr.bf16.mxu1 %v1326_v22 }
  0x78   : > { %1191 = vmatpush3.bf16.msra.mxu0 %v1325_v23 }
  0x79   : > { %1192 = vmatprep.subr.bf16.mxu0 %v1598_v3  ;;  %797 = vmatpush1.bf16.msra.mxu1 %v1328_v24 }
  0x7a   : > { %798 = vmatprep.subr.bf16.mxu1 %v1330_v26 }
  0x7c   : > { %1193 = vmatpush3.bf16.msra.mxu0 %v1329_v25 }
  0x7d   : > { %825 = vmatprep.subr.bf16.mxu0 %v1335_v28  ;;  %799 = vmatpush1.bf16.msra.mxu1 %v1332_v29 }
  0x7f   : > { %1195 = vmatmul.mubr.bf16.vlgmr.msra.gmra.mxu0 %v463_v31 }
  0x80   : > { %826 = vmatpush1.bf16.msra.mxu0 %v1333_v32  ;;  %857 = vmatprep.mubr.bf16.mxu0 %v1600_v9 }
  0x81   : > { %817 = vmatmul.mubr.bf16.vlgmr.msra.gmra.mxu1 %v585_v34  ;;  %827 = vmatprep.subr.bf16.mxu0 %v1338_v35 }
  0x84   : > { %828 = vmatpush1.bf16.msra.mxu0 %v1336_v36 }
  0x85   : > { %829 = vmatprep.subr.bf16.mxu0 %v1341_v37 }
  0x88   : > { %830 = vmatpush1.bf16.msra.mxu0 %v1339_v38 }
  0x89   : > { %831 = vmatprep.subr.bf16.mxu0 %v1344_v39 }
  0x8c   : > { %832 = vmatpush1.bf16.msra.mxu0 %v1342_v40 }
  0x8d   : > { %833 = vmatprep.subr.bf16.mxu0 %v1347_v41 }
  0x90   : > { %834 = vmatpush1.bf16.msra.mxu0 %v1345_v42 }
  0x91   : > { %835 = vmatprep.subr.bf16.mxu0 %v1350_v43 }
  0x94   : > { %836 = vmatpush1.bf16.msra.mxu0 %v1348_v44 }
  0x95   : > { %837 = vmatprep.subr.bf16.mxu0 %v1353_v45 }
  0x98   : > { %838 = vmatpush1.bf16.msra.mxu0 %v1351_v46 }
  0x99   : > { %839 = vmatprep.subr.bf16.mxu0 %v1356_v47 }
  0x9c   : > { %840 = vmatpush1.bf16.msra.mxu0 %v1354_v48 }
  0x9f   : > { %858 = vmatmul.mubr.bf16.vlgmr.msra.gmra.mxu0 %v585_v34 }
  0xe1   : > { %v581_v17 = vpop.permute.xlu0 %580 }
 0x13f   : > { %v569_v49 = vpop.f32.mrf.mxu0 }
 0x140   : > { %v570_v1 = vadd.f32 %v1115_v0, %v569_v49 }
 0x141   : > { %v818_v51 = vpop.f32.mrf.mxu1  ;;  %v1196_v52 = vpop.f32.mrf.mxu0 }
 0x142   : > { %v819_v59 = vadd.f32 %v818_v51, %v620_v53 }
 0x143   : > { %v572_v54 = vpop.f32.mrf.mxu0  ;;  %v820_v56 = vpop.f32.mrf.mxu1 }
 0x144   : > { %v821_v60 = vadd.f32 %v820_v56, %v621_v55  ;;  %v1156_v62 = vmul.f32 -1.442695, %v819_v59 }
 0x145   : > { %v1197_v57 = vpop.f32.mrf.mxu0  ;;  %v822_v58 = vpop.f32.mrf.mxu1 }
 0x146   : > { %v1157_v63 = vmul.f32 -1.442695, %v821_v60  ;;  %1357 = vpow2.f32 %v1156_v62 }
 0x147   : > { %v823_v61 = vpop.f32.mrf.mxu1 }
 0x148   : > { %1359 = vpow2.f32 %v1157_v63 }
 0x149   : > { %1361 = vtanh.f32 %v570_v1 }
 0x153   : > { %v1358_v3 = vpop.eup %1357 }
 0x154   : > { %v869_v6 = vadd.f32 1.0, %v1358_v3 }
 0x155   : > { %v1360_v4 = vpop.eup %1359 }
 0x156   : > { %v875_v8 = vadd.f32 1.0, %v1360_v4  ;;  %1363 = vrcp.f32 %v869_v6  ;;  %v1362_v16 = vpop.eup %1361 }
 0x157   : > { %v577_v18 = vsub.f32 %v1827_v27, %v1362_v16  ;;  %v583_v19 = vmul.f32 %v1362_v16, %v581_v17 }
 0x158   : > { %1365 = vrcp.f32 %v875_v8 }
 0x159   : > { %v584_v23 = vadd.f32 %v583_v19, %v577_v18 }
 0x15f   : > { %v859_v9 = vpop.f32.mrf.mxu0 }
 0x160   : > { %v860_v10 = vadd.f32 %v859_v9, %v622_v5 }
 0x161   : > { %v861_v11 = vpop.f32.mrf.mxu0 }
 0x162   : > { %v1158_v12 = vmul.f32 -1.442695, %v860_v10  ;;  %v862_v13 = vadd.f32 %v861_v11, %v623_v7 }
 0x163   : > { %v863_v14 = vpop.f32.mrf.mxu0  ;;  %v1364_v20 = vpop.eup %1363 }
 0x164   : > { %1367 = vpow2.f32 %v1158_v12  ;;  %v885_v26 = vmul.f32 %v1364_v20, %v584_v23 }
 0x165   : > { %1369 = vtanh.f32 %v862_v13  ;;  %v864_v15 = vpop.f32.mrf.mxu0  ;;  %v1366_v21 = vpop.eup %1365 }
 0x171   : > { %v1368_v22 = vpop.eup %1367 }
 0x172   : > { %v1370_v24 = vpop.eup %1369  ;;  %v881_v25 = vadd.f32 1.0, %v1368_v22 }
 0x173   : > { %v886_v28 = vmul.f32 %v1370_v24, %v1366_v21 }
 0x174   : > { %1371 = vrcp.f32 %v881_v25 }
 0x175   : > { %v887_v29 = vadd.f32 %v886_v28, %v885_v26 }
 0x177   : > { %1373 = vtanh.f32 %v887_v29  ;;  %891 = vst [vmem:[#allocation3] sm:$0xff] %v887_v29 }
 0x181   : > { %v1372_v30 = vpop.eup %1371 }
 0x183   : > { %896 = sbr.rel (%p1159_p5) target bundleno = 393 (0x189), region = 68 }
 0x184   : > { %v1374_v31 = vpop.eup %1373 }
 0x185   : > { %v889_v32 = vmul.f32 %v1374_v31, %v1372_v30 }
 0x187   : > { %890 = vst [vmem:[#allocation2] sm:$0xff] %v889_v32  ;;  %892 = vst [vmem:[%s1797_s19] sm:$0xff] %v889_v32 }
 0x188   : > { %897 = vst [vmem:[#allocation11] sm:$0xff] %v889_v32  ;;  %898 = vst [vmem:[#allocation13] sm:$0xff] %v887_v29 }
 0x189 PF: > { %s1601_s23 = smov [#allocation11]   ;;  %s1161_s30 = sshll.u32 %s1583_s12, 7 }
 0x18a   : > { %s927_s3 = sshll.u32 %s1601_s23, 4  ;;  %p1937_p9 = scmp.ne.s32.totalorder %s1922_s18, 0  ;;  %s928_s3 = int_to_ptr.vmem [resolvable:$true] %s927_s3 }
 0x18b   : > { %s1455_s13 = scalar_lea.vmem %s928_s3, 128  ;;  %p1462_p1 = scmp.lt.s32.totalorder %s928_s3, %s928_s3 }
 0x18c   : > { %p1456_p7 = scmp.ne.s32.totalorder %s928_s3, %s1455_s13  ;;  %p1463_p2 = scmp.lt.s32.totalorder %s1455_s13, %s1455_s13 }
 0x18e   : > { %p1457_p12 = pnand %p1456_p7, %p1937_p9  ;;  %p1464_p4 = por %p1463_p2, %p1462_p1 }
 0x190   : > { %p1458_p13 = pneg %p1457_p12 }
 0x192   : > { %p1465_p6 = pnand %p1464_p4, %p1458_p13 }
 0x194   : > { %1468 = shalt.err (!%p1465_p6)
}
 0x195   : > { %1210 = dma.vmem_to_hbm [thread:$0]  (%p1937_p9), %s928_s3, 128, %s1906_s8, [#allocation12]  }
 0x196   : > { %s912_s17 = scalar_lea.hbm %s1905_s7, %s1161_s30  ;;  %s914_s26 = sshll.u32 %s1797_s19, 4  ;;  %s915_s26 = int_to_ptr.vmem [resolvable:$true] %s914_s26 }
 0x197   : > { %s900_s28 = scalar_lea.sflag [#allocation6], %s1775_s6  ;;  %s1479_s16 = scalar_lea.vmem %s915_s26, 128 }
 0x198   : > { %p1480_p8 = scmp.ne.s32.totalorder %s915_s26, %s1479_s16  ;;  %s1602_s15 = smov [#allocation10]  }
 0x199   : > { %s1483_s27 = sshll.u32 %s1602_s15, 4  ;;  %s1484_s27 = int_to_ptr.vmem [resolvable:$false] %s1483_s27 }
 0x19a   : > { %p1481_p11 = pnand %p1480_p8, %p1748_p0  ;;  %s1485_s25 = scalar_lea.vmem %s1484_s27, 256 }
 0x19b   : > { %p1486_p10 = scmp.lt.s32.totalorder %s915_s26, %s1484_s27  ;;  %p1487_p5 = scmp.lt.s32.totalorder %s1485_s25, %s1479_s16 }
 0x19c   : > { %p1482_p3 = pneg %p1481_p11 }
 0x19d   : > { %p1488_p7 = por %p1487_p5, %p1486_p10 }
 0x19f   : > { %p1489_p12 = pnand %p1488_p7, %p1482_p3 }
 0x1a1   : > { %1492 = shalt.err (!%p1489_p12)
}
 0x1a2   : > { %s1493_s23 = scalar_lea.hbm %s912_s17, 128  ;;  %s1497_s3 = scalar_lea.hbm %s1905_s7, 1024 }
 0x1a3   : > { %p1494_p13 = scmp.ne.s32.totalorder %s912_s17, %s1493_s23  ;;  %p1498_p4 = scmp.lt.s32.totalorder %s912_s17, %s1905_s7 }
 0x1a4   : > { %p1499_p6 = scmp.lt.s32.totalorder %s1497_s3, %s1493_s23 }
 0x1a5   : > { %p1495_p1 = pnand %p1494_p13, %p1748_p0 }
 0x1a6   : > { %p1500_p8 = por %p1499_p6, %p1498_p4 }
 0x1a7   : > { %p1496_p2 = pneg %p1495_p1 }
 0x1a9   : > { %p1501_p11 = pnand %p1500_p8, %p1496_p2 }
 0x1ab   : > { %1504 = shalt.err (!%p1501_p11)
}
 0x1ac   : > { %1208 = dma.vmem_to_hbm [thread:$0]  (%p1748_p0), %s915_s26, 128, %s912_s17, %s900_s28  }
 0x1ad   : > { %s1603_s20 = smov [#allocation13]  }
 0x1ae   : > { %s940_s21 = sshll.u32 %s1603_s20, 4  ;;  %s941_s21 = int_to_ptr.vmem [resolvable:$true] %s940_s21 }
 0x1af   : > { %s1505_s12 = scalar_lea.vmem %s941_s21, 128  ;;  %p1512_p7 = scmp.lt.s32.totalorder %s941_s21, %s941_s21 }
 0x1b0   : > { %p1506_p3 = scmp.ne.s32.totalorder %s941_s21, %s1505_s12  ;;  %p1513_p12 = scmp.lt.s32.totalorder %s1505_s12, %s1505_s12 }
 0x1b2   : > { %p1507_p10 = pnand %p1506_p3, %p1937_p9  ;;  %p1514_p13 = por %p1513_p12, %p1512_p7 }
 0x1b4   : > { %p1508_p5 = pneg %p1507_p10 }
 0x1b6   : > { %p1515_p1 = pnand %p1514_p13, %p1508_p5 }
 0x1b8   : > { %1518 = shalt.err (!%p1515_p1)
}
 0x1b9   : > { %1212 = dma.vmem_to_hbm [thread:$0]  (%p1937_p9), %s941_s21, 128, %s1907_s9, [#allocation12]  }
 0x1ba   : > { %1562 = dma.done.wait (%p1937_p9), [#allocation12], 256  }
 0x1bb   : > { %1564 = vsyncadd (%p1937_p9), [#allocation12], 4294967040 }
 0x1bc PF: > { %s1938_s29 = sld [smem:[#allocation18_spill]]  ;;  %p1242_p0 = scmp.ge.s32.totalorder %s1591_s14, 2 }
 0x1bd   : > { %s1939_s17 = sld [smem:[#allocation20_spill]] }
 0x1c2   : > { %s960_s26 = sand.u32 1, %s1938_s29  }
 0x1c3   : > { %p1940_p2 = scmp.ne.s32.totalorder %s1939_s17, 0  ;;  %s961_s28 = scalar_lea.sflag [#allocation6], %s960_s26 }
 0x1c5   : > { %p1230_p4 = pnand %p1242_p0, %p1940_p2 }
 0x1c7   : > { %p1231_p6 = pneg %p1230_p4 }
 0x1c9   : > { %1566 = dma.done.wait (%p1231_p6), %s961_s28, 128  }
 0x1ca   : > { %1568 = vsyncadd (%p1231_p6), %s961_s28, 4294967168  ;;  %s28_s14 = sadd.s32 1, %s1591_s14   ;;  %s1941_s12 = sld [smem:[#allocation19_spill]] }
 0x1cb   : > { %p25_p8 = scmp.ge.s32.totalorder %s28_s14, 10   ;;  %s1942_s13 = sld [smem:[#allocation21_spill]] }
 0x1cc   : > { %s1943_s30 = smov %s1575_s10  ;;  %s1944_s10 = smov %s1579_s11 }
 0x1cd   : > { %s1945_s11 = smov %s1757_s22  ;;  %27 = sbr.rel (!%p25_p8) target bundleno = 11 (0xb), region = 134 }
 0x1d2   :  { %966 = vsyncpa [#allocation5], 1 }
 0x1d3   :  { %968 = vsyncpa [#allocation5 + $0x1], 1 }
 0x1d4   :  { %969 = vsyncpa [#allocation8], 1 }
 0x1d5   :  { %970 = vsyncpa [#allocation6], 1 }
 0x1d6   :  { %972 = vsyncpa [#allocation6 + $0x1], 1 }
 0x1d7   :  { %973 = vsyncpa [#allocation12], 1 }

</bundles_post_ra>
